<compile_context>
chip_gen: v6e
topology: v6e:2x2x1
jax: 0.10.0
libtpu: 0.0.40
codegen_flags: <defaults>
</compile_context>

<pallas_src>
import jax
import jax.numpy as jnp
from jax.experimental import pallas as pl
from jax.experimental.pallas import tpu as pltpu

_LANE = 128
_SUBLANE = 8
_EPS = 2.3e-8


def _round_up(v, m):
    return -(-v // m) * m


def _vmem_budget():
    """(vmem_limit_bytes, per-step byte budget, tensorcores-per-chip)."""
    phys = 64 << 20                      # conservative fallback (v7x per-TC VMEM)
    try:
        phys = int(pltpu.get_tpu_info().vmem_capacity_bytes)
    except Exception:
        pass
    # v7x: 64 MiB per TensorCore, 2 TCs/chip.  v5e/v6e: 128 MiB, 1 TC.
    cores = 2 if phys <= (64 << 20) else 1
    limit = min((phys * 3) // 4, 112 << 20)   # ~48 MiB on v7x, ~96 MiB on v5e/v6e
    budget = (limit * 17) // 20               # ~85%: headroom for misc scratch
    return limit, budget, cores


def _per_row_vmem_bytes(N, M, D, itemsize):
    """Conservative VMEM bytes per unit of tile_s: the double-buffered pipeline
    copies of x / y / out in the input dtype, plus the f32 temporaries the
    kernel body materializes (x, xc, out-expression; y, yc) and the keepdims
    stats planes, all at their (sublane, lane)-padded sizes."""
    sub_in = _SUBLANE * max(1, 4 // itemsize)        # 8 f32, 16 bf16, 32 int8
    Dp = _round_up(D, _LANE)
    pipe = 2 * (2 * _round_up(N, sub_in) + _round_up(M, sub_in)) * Dp * itemsize
    temps = (3 * _round_up(N, _SUBLANE) + 2 * _round_up(M, _SUBLANE)) * Dp * 4
    stats = 6 * _SUBLANE * Dp * 4                    # mu/ssq/scale keepdims planes
    return pipe + temps + stats


def _pick_grid(S, per_row, budget, cores):
    """Largest tile_s whose per-step working set fits the budget; on 2-TC parts
    ensure at least `cores` grid steps (and an even count) so megacore splits
    the S axis evenly."""
    tile_s = max(1, min(S, budget // max(1, per_row)))
    steps = pl.cdiv(S, tile_s)
    if cores > 1 and S > 1:
        target = max(cores, steps)
        if target % cores:
            target += cores - (target % cores)
        tile_s = pl.cdiv(S, target)
        steps = pl.cdiv(S, tile_s)
    return tile_s, steps


def _adain_kernel(x_ref, y_ref, o_ref):
    """AdaIN transfer on one (tile_s, N/M, D) tile.

    The stats axis (axis 1) is fully inside the block, so reductions are local.
    The sqrt/rsqrt pair is fused into one rsqrt on the stats-shaped tensor; the
    per-element path is multiply-add only, computed in f32 and cast at store.
    """
    x = x_ref[...].astype(jnp.float32)
    y = y_ref[...].astype(jnp.float32)
    n_x = x.shape[1]
    n_y = y.shape[1]

    # mean over the stats axis (eq. 5 of the paper)
    mu_x = jnp.sum(x, axis=1, keepdims=True) * (1.0 / n_x)
    mu_y = jnp.sum(y, axis=1, keepdims=True) * (1.0 / n_y)

    # center once; reuse for both the variance sum and the output expression
    xc = x - mu_x
    yc = y - mu_y

    # eps is added to the raw sum of squares, matching the PyTorch module
    ssq_x = jnp.sum(xc * xc, axis=1, keepdims=True)
    ssq_y = jnp.sum(yc * yc, axis=1, keepdims=True)

    # sigma(y)/sigma(x) = sqrt((ssq_y+eps)/n_y) / sqrt((ssq_x+eps)/n_x)
    #                   = rsqrt(((ssq_x+eps)*n_y) / ((ssq_y+eps)*n_x))
    scale = jax.lax.rsqrt(((ssq_x + _EPS) * float(n_y)) /
                          ((ssq_y + _EPS) * float(n_x)))

    o_ref[...] = (xc * scale + mu_y).astype(o_ref.dtype)


def adain_trans(x, y):
    """AdaIN_trans.forward: content x (S, N, D), style y (S, M, D) -> (S, N, D)."""
    S, N, D = x.shape
    Sy, M, Dy = y.shape
    assert S == Sy and D == Dy, "style must share dims 0 and 2 with content"

    x_item = jnp.dtype(x.dtype).itemsize
    y_item = jnp.dtype(y.dtype).itemsize

    vmem_limit, budget, cores = _vmem_budget()
    per_row = _per_row_vmem_bytes(N, M, D, max(x_item, y_item))
    tile_s, steps = _pick_grid(S, per_row, budget, cores)

    cost = pl.CostEstimate(
        flops=10 * S * (N + M) * D,
        transcendentals=S * D,
        bytes_accessed=S * N * D * x_item + S * M * D * y_item + S * N * D * x_item,
    )

    return pl.pallas_call(
        _adain_kernel,
        out_shape=jax.ShapeDtypeStruct((S, N, D), x.dtype),
        grid_spec=pltpu.PrefetchScalarGridSpec(
            num_scalar_prefetch=0,
            grid=(steps,),
            in_specs=[
                pl.BlockSpec((tile_s, N, D), lambda i: (i, 0, 0)),
                pl.BlockSpec((tile_s, M, D), lambda i: (i, 0, 0)),
            ],
            out_specs=pl.BlockSpec((tile_s, N, D), lambda i: (i, 0, 0)),
        ),
        compiler_params=pltpu.CompilerParams(
            dimension_semantics=("parallel",),
            vmem_limit_bytes=int(vmem_limit),
        ),
        cost_estimate=cost,
    )(x, y)


def adain_trans_ref(x, y):
    """Pure-JAX reference mirroring the PyTorch permute/broadcast semantics."""
    x = x.astype(jnp.float32)
    y = y.astype(jnp.float32)

    def mu(t):
        return jnp.sum(t, axis=1) / t.shape[1]

    def sigma(t):
        centered = jnp.transpose(t, (1, 0, 2)) - mu(t)           # (d1, d0, D)
        centered = jnp.transpose(centered, (1, 0, 2))            # (d0, d1, D)
        return jnp.sqrt((jnp.sum(centered ** 2, axis=1) + _EPS) / t.shape[1])

    xt = jnp.transpose(x, (1, 0, 2))                             # (N, S, D)
    out = sigma(y) * ((xt - mu(x)) / sigma(x)) + mu(y)           # (N, S, D)
    return jnp.transpose(out, (1, 0, 2))                         # (S, N, D)


if __name__ == "__main__":
    # AdaIN_trans has no parameters (empty __init__), nothing to initialize.
    key = jax.random.PRNGKey(0)
    kx, ky, ka, kb, kc, kd = jax.random.split(key, 6)

    # Small ragged shape (N < 8, D < 128): seq=8, batch=2, hidden=32.
    S, N, D = 8, 2, 32
    x = jax.random.normal(kx, (S, N, D), dtype=jnp.float32)
    y = jax.random.normal(ky, (S, N, D), dtype=jnp.float32) * 2.0 + 0.5
    out = jax.block_until_ready(adain_trans(x, y))
    assert out.shape == (S, N, D)
    assert jnp.allclose(out, adain_trans_ref(x, y), atol=2e-5, rtol=2e-5), \
        "mismatch vs reference (ragged shape)"

    # Vreg-dense planes: seq=8, batch=8, hidden=128.
    S2, N2, D2 = 8, 8, 128
    x2 = jax.random.normal(ka, (S2, N2, D2), dtype=jnp.float32)
    y2 = jax.random.normal(kb, (S2, N2, D2), dtype=jnp.float32) * 0.5 - 1.0
    out2 = jax.block_until_ready(adain_trans(x2, y2))
    assert out2.shape == (S2, N2, D2)
    assert jnp.allclose(out2, adain_trans_ref(x2, y2), atol=2e-5, rtol=2e-5), \
        "mismatch vs reference (dense shape)"

    # Odd S and a different style batch (M != N): exercises the cdiv partial
    # last block and the broadcasted stats from a differently-sized style set.
    S3, N3, M3, D3 = 37, 4, 6, 96
    x3 = jax.random.normal(kc, (S3, N3, D3), dtype=jnp.float32)
    y3 = jax.random.normal(kd, (S3, M3, D3), dtype=jnp.float32) * 0.7 + 1.0
    out3 = jax.block_until_ready(adain_trans(x3, y3))
    assert out3.shape == (S3, N3, D3)
    assert jnp.allclose(out3, adain_trans_ref(x3, y3), atol=2e-5, rtol=2e-5), \
        "mismatch vs reference (partial last block)"

    print("KERNEL_OK")
</pallas_src>

<mosaic_0001>
module attributes {stable_mosaic.version = 11 : i64} {
  func.func @_adain_kernel(%arg0: i32, %arg1: memref<4x2x32xf32, #tpu.memory_space<vmem>>, %arg2: memref<4x2x32xf32, #tpu.memory_space<vmem>>, %arg3: memref<4x2x32xf32, #tpu.memory_space<vmem>>) attributes {dimension_semantics = [#tpu.dimension_semantics<parallel>], iteration_bounds = array<i64: 2>, scalar_prefetch = 0 : i64, scratch_operands = 0 : i64, tpu.core_type = #tpu.core_type<tc>, window_params = [{transform_indices = @transform_0, window_bounds = array<i64: 4, 2, 32>}, {transform_indices = @transform_1, window_bounds = array<i64: 4, 2, 32>}, {transform_indices = @transform_2, window_bounds = array<i64: 4, 2, 32>}]} {
    %c0 = arith.constant 0 : index
    %c0_0 = arith.constant 0 : index
    %c0_1 = arith.constant 0 : index
    %0 = vector.load %arg1[%c0, %c0_0, %c0_1] : memref<4x2x32xf32, #tpu.memory_space<vmem>>, vector<4x2x32xf32>
    %c0_2 = arith.constant 0 : index
    %c0_3 = arith.constant 0 : index
    %c0_4 = arith.constant 0 : index
    %1 = vector.load %arg2[%c0_2, %c0_3, %c0_4] : memref<4x2x32xf32, #tpu.memory_space<vmem>>, vector<4x2x32xf32>
    %cst = arith.constant dense<0.000000e+00> : vector<4x32xf32>
    %2 = vector.multi_reduction <add>, %0, %cst [1] : vector<4x2x32xf32> to vector<4x32xf32>
    %3 = vector.shape_cast %2 : vector<4x32xf32> to vector<4x1x32xf32>
    %cst_5 = arith.constant 5.000000e-01 : f32
    %4 = vector.broadcast %cst_5 : f32 to vector<4x1x32xf32>
    %5 = arith.mulf %3, %4 : vector<4x1x32xf32>
    %cst_6 = arith.constant dense<0.000000e+00> : vector<4x32xf32>
    %6 = vector.multi_reduction <add>, %1, %cst_6 [1] : vector<4x2x32xf32> to vector<4x32xf32>
    %7 = vector.shape_cast %6 : vector<4x32xf32> to vector<4x1x32xf32>
    %cst_7 = arith.constant 5.000000e-01 : f32
    %8 = vector.broadcast %cst_7 : f32 to vector<4x1x32xf32>
    %9 = arith.mulf %7, %8 : vector<4x1x32xf32>
    %10 = vector.broadcast %5 : vector<4x1x32xf32> to vector<4x2x32xf32>
    %11 = arith.subf %0, %10 : vector<4x2x32xf32>
    %12 = vector.broadcast %9 : vector<4x1x32xf32> to vector<4x2x32xf32>
    %13 = arith.subf %1, %12 : vector<4x2x32xf32>
    %14 = arith.mulf %11, %11 : vector<4x2x32xf32>
    %cst_8 = arith.constant dense<0.000000e+00> : vector<4x32xf32>
    %15 = vector.multi_reduction <add>, %14, %cst_8 [1] : vector<4x2x32xf32> to vector<4x32xf32>
    %16 = vector.shape_cast %15 : vector<4x32xf32> to vector<4x1x32xf32>
    %17 = arith.mulf %13, %13 : vector<4x2x32xf32>
    %cst_9 = arith.constant dense<0.000000e+00> : vector<4x32xf32>
    %18 = vector.multi_reduction <add>, %17, %cst_9 [1] : vector<4x2x32xf32> to vector<4x32xf32>
    %19 = vector.shape_cast %18 : vector<4x32xf32> to vector<4x1x32xf32>
    %cst_10 = arith.constant 2.300000e-08 : f32
    %20 = vector.broadcast %cst_10 : f32 to vector<4x1x32xf32>
    %21 = arith.addf %16, %20 : vector<4x1x32xf32>
    %cst_11 = arith.constant 2.000000e+00 : f32
    %22 = vector.broadcast %cst_11 : f32 to vector<4x1x32xf32>
    %23 = arith.mulf %21, %22 : vector<4x1x32xf32>
    %cst_12 = arith.constant 2.300000e-08 : f32
    %24 = vector.broadcast %cst_12 : f32 to vector<4x1x32xf32>
    %25 = arith.addf %19, %24 : vector<4x1x32xf32>
    %cst_13 = arith.constant 2.000000e+00 : f32
    %26 = vector.broadcast %cst_13 : f32 to vector<4x1x32xf32>
    %27 = arith.mulf %25, %26 : vector<4x1x32xf32>
    %28 = arith.divf %23, %27 : vector<4x1x32xf32>
    %29 = math.rsqrt %28 : vector<4x1x32xf32>
    %30 = vector.broadcast %29 : vector<4x1x32xf32> to vector<4x2x32xf32>
    %31 = arith.mulf %11, %30 : vector<4x2x32xf32>
    %32 = vector.broadcast %9 : vector<4x1x32xf32> to vector<4x2x32xf32>
    %33 = arith.addf %31, %32 : vector<4x2x32xf32>
    %c0_14 = arith.constant 0 : index
    %c0_15 = arith.constant 0 : index
    %c0_16 = arith.constant 0 : index
    %34 = vector.load %arg3[%c0_14, %c0_15, %c0_16] : memref<4x2x32xf32, #tpu.memory_space<vmem>>, vector<4x2x32xf32>
    tpu.vector_store %arg3[%c0_14, %c0_15, %c0_16], %33 {strides = array<i32>} : memref<4x2x32xf32, #tpu.memory_space<vmem>>, vector<4x2x32xf32>,
    return
  }
  func.func @transform_0(%arg0: i32) -> (i32, i32, i32) {
    %c0_i32 = arith.constant 0 : i32
    %c0_i32_0 = arith.constant 0 : i32
    %c0_i32_1 = arith.constant 0 : i32
    return %arg0, %c0_i32, %c0_i32_0 : i32, i32, i32
  }
  func.func @transform_1(%arg0: i32) -> (i32, i32, i32) {
    %c0_i32 = arith.constant 0 : i32
    %c0_i32_0 = arith.constant 0 : i32
    %c0_i32_1 = arith.constant 0 : i32
    return %arg0, %c0_i32, %c0_i32_0 : i32, i32, i32
  }
  func.func @transform_2(%arg0: i32) -> (i32, i32, i32) {
    %c0_i32 = arith.constant 0 : i32
    %c0_i32_0 = arith.constant 0 : i32
    %c0_i32_1 = arith.constant 0 : i32
    return %arg0, %c0_i32, %c0_i32_0 : i32, i32, i32
  }
}

</mosaic_0001>

<bundles_post_ra>
// kernel: tpu_custom_call.1
= control target key start
LH: loop header
LB: loop body
LE: loop exit
PB: predicated region body
PF: predicated region fallthrough
CT: control target
= control target key end

     0   :  { %7 = vsyncpa [#allocation3], 0  ;;  %s1051_s0 = inlined_call_operand.hbm [shape: f32[8,2,32], index: 0, kind: input, shape index: {}]   ;;  %s1052_s1 = inlined_call_operand.hbm [shape: f32[8,2,32], index: 1, kind: input, shape index: {}]   ;;  %s1053_s2 = inlined_call_operand.hbm [shape: f32[8,2,32], index: 2, kind: output, shape index: {}]  }
   0x1   :  { %9 = vsyncpa [#allocation3 + $0x1], 0 }
   0x2   :  { %10 = vsyncpa [#allocation6], 0 }
   0x3   :  { %12 = vsyncpa [#allocation6 + $0x1], 0 }
   0x4   :  { %13 = vsyncpa [#allocation4], 0 }
   0x5   :  { %15 = vsyncpa [#allocation4 + $0x1], 0  ;;  %s740_s9 = smov 0   ;;  %s742_s10 = smov 0  }
   0x6   :  { %s744_s11 = smov 0   ;;  %s746_s12 = smov 0  }
   0x7 LB: > { %s761_s13 = sadd.s32 4294967295, %s716_s12   ;;  %s500_s14 = sadd.s32 4294967294, %s716_s12   ;;  %s716_s12 = sphi %s746_s12, %s1069_s12   ;;  %s712_s11 = sphi %s744_s11, %s1068_s11   ;;  %s708_s10 = sphi %s742_s10, %s1067_s10   ;;  %s704_s9 = sphi %s740_s9, %s1066_s9  }
   0x8   : > { %s765_s15 = sadd.s32 1, %s716_s12   ;;  %s28_s16 = sadd.s32 1, %s712_s11 }
   0x9   : > { %s25_s17 = ssub.s32 %s716_s12, %s765_s15  ;;  %p35_p0 = scmp.ne.s32.totalorder %s712_s11, %s708_s10 }
   0xa   : > { %p26_p1 = scmp.eq.s32.totalorder %s25_s17, 0  ;;  %p36_p2 = scmp.eq.s32.totalorder %s716_s12, 0 }
   0xb   : > { %p41_p3 = scmp.ne.s32.totalorder %s708_s10, %s704_s9  ;;  %p42_p4 = scmp.eq.s32.totalorder %s761_s13, 0 }
   0xc   : > { %s777_s18 = scalar_select %p26_p1, %s712_s11, %s28_s16  }
   0xd   : > { %p779_p5 = por %p36_p2, %p35_p0  ;;  %p783_p6 = por %p42_p4, %p41_p3 }
   0xe   : > { %p91_p7 = scmp.eq.s32.totalorder %s761_s13, 1  ;;  %p97_p8 = scmp.eq.s32.totalorder %s500_s14, 1 }
   0xf   : > { %s1057_s20 = scalar_select %p783_p6, 1, 0 }
  0x10   : > { %p538_p10 = scmp.lt.s32.totalorder %s716_s12, 2  ;;  %p790_p11 = por %p91_p7, %p35_p0 }
  0x11   : > { %p794_p12 = por %p97_p8, %p41_p3  ;;  %s799_s23 = sand.u32 1, %s712_s11  }
  0x12   : > { %s1058_s21 = scalar_select %p790_p11, 1, 0 }
  0x13   : > { %s1059_s22 = scalar_select %p794_p12, 1, 0 }
  0x14   : > { %s518_s24 = sshll.u32 %s716_s12, 7  ;;  %s503_s25 = sshll.u32 %s799_s23, 3 }
  0x15   : > { %s808_s28 = scalar_lea.hbm %s1051_s0, %s518_s24  ;;  %s121_s29 = scalar_lea.vmem [#allocation2], %s503_s25 }
  0x16   : > { %s128_s30 = sshll.u32 %s121_s29, 4  ;;  %p814_p13 = pnand %p538_p10, %p779_p5  ;;  %s818_s30 = int_to_ptr.vmem [resolvable:$true] %s128_s30 }
  0x17   : > { %s118_s4 = scalar_lea.sflag [#allocation3], %s799_s23  ;;  %s592_s5 = scalar_lea.hbm %s808_s28, 128 }
  0x18   : > { %p593_p0 = scmp.ne.s32.totalorder %s808_s28, %s592_s5  ;;  %p594_p1 = pneg %p814_p13 }
  0x19   : > { %s597_s8 = scalar_lea.hbm %s1051_s0, 256  ;;  %p598_p4 = scmp.lt.s32.totalorder %s808_s28, %s1051_s0 }
  0x1a   : > { %p595_p2 = pnand %p594_p1, %p593_p0  ;;  %p599_p5 = scmp.lt.s32.totalorder %s597_s8, %s592_s5 }
  0x1c   : > { %p596_p3 = pneg %p595_p2  ;;  %p600_p7 = por %p599_p5, %p598_p4 }
  0x1e   : > { %p601_p8 = pnand %p600_p7, %p596_p3 }
  0x20   : > { %604 = shalt.err (!%p601_p8)
}
  0x21   : > { %s605_s17 = scalar_lea.vmem %s818_s30, 128  ;;  %s718_s19 = smov [#allocation2]  }
  0x22   : > { %p606_p10 = scmp.ne.s32.totalorder %s818_s30, %s605_s17  ;;  %s610_s26 = sshll.u32 %s718_s19, 4  ;;  %s611_s26 = int_to_ptr.vmem [resolvable:$false] %s610_s26 }
  0x23   : > { %s612_s27 = scalar_lea.vmem %s611_s26, 256  ;;  %p613_p9 = scmp.lt.s32.totalorder %s818_s30, %s611_s26 }
  0x24   : > { %p608_p0 = pnand %p606_p10, %p594_p1  ;;  %p614_p12 = scmp.lt.s32.totalorder %s612_s27, %s605_s17 }
  0x26   : > { %p609_p2 = pneg %p608_p0  ;;  %p615_p11 = por %p614_p12, %p613_p9 }
  0x28   : > { %p616_p4 = pnand %p615_p11, %p609_p2 }
  0x2a   : > { %619 = shalt.err (!%p616_p4)
}
  0x2b   : > { %s719_s29 = smov 32   ;;  %s720_s5 = smov 2  }
  0x2c   : > { %530 = dma.hbm_to_vmem [thread:$0]  (!%p814_p13), %s808_s28, 128, %s818_s30, %s118_s4, %s719_s29, %s719_s29, %s720_s5  }
  0x2d   : > { %p509_p9 = scmp.ge.s32.totalorder %s716_s12, 1  ;;  %p157_p11 = scmp.lt.s32.totalorder %s716_s12, 3 }
  0x2e   : > { %s861_s14 = scalar_lea.hbm %s1052_s1, %s518_s24  ;;  %s142_s16 = scalar_lea.vmem [#allocation5], %s503_s25 }
  0x2f   : > { %p852_p12 = pnand %p509_p9, %p157_p11  ;;  %s149_s17 = sshll.u32 %s142_s16, 4  ;;  %s865_s17 = int_to_ptr.vmem [resolvable:$true] %s149_s17 }
  0x30   : > { %s139_s28 = scalar_lea.sflag [#allocation6], %s799_s23  ;;  %s620_s30 = scalar_lea.hbm %s861_s14, 128 }
  0x31   : > { %p621_p3 = scmp.ne.s32.totalorder %s861_s14, %s620_s30  ;;  %s625_s24 = scalar_lea.hbm %s1052_s1, 256 }
  0x32   : > { %p626_p8 = scmp.lt.s32.totalorder %s861_s14, %s1052_s1  ;;  %p627_p10 = scmp.lt.s32.totalorder %s625_s24, %s620_s30 }
  0x33   : > { %p623_p5 = pnand %p621_p3, %p594_p1 }
  0x34   : > { %p628_p0 = por %p627_p10, %p626_p8 }
  0x35   : > { %p624_p7 = pneg %p623_p5 }
  0x37   : > { %p629_p2 = pnand %p628_p0, %p624_p7 }
  0x39   : > { %632 = shalt.err (!%p629_p2)
}
  0x3a   : > { %s633_s23 = scalar_lea.vmem %s865_s17, 128  ;;  %s721_s25 = smov [#allocation5]  }
  0x3b   : > { %p634_p4 = scmp.ne.s32.totalorder %s865_s17, %s633_s23  ;;  %s638_s7 = sshll.u32 %s721_s25, 4  ;;  %s639_s7 = int_to_ptr.vmem [resolvable:$false] %s638_s7 }
  0x3c   : > { %s640_s8 = scalar_lea.vmem %s639_s7, 256  ;;  %p641_p3 = scmp.lt.s32.totalorder %s865_s17, %s639_s7 }
  0x3d   : > { %p636_p9 = pnand %p634_p4, %p594_p1  ;;  %p642_p5 = scmp.lt.s32.totalorder %s640_s8, %s633_s23 }
  0x3f   : > { %p637_p11 = pneg %p636_p9  ;;  %p643_p6 = por %p642_p5, %p641_p3 }
  0x41   : > { %p644_p8 = pnand %p643_p6, %p637_p11 }
  0x43   : > { %647 = shalt.err (!%p644_p8)
}
  0x44   : > { %533 = dma.hbm_to_vmem [thread:$0]  (!%p814_p13), %s861_s14, 128, %s865_s17, %s139_s28, %s719_s29, %s719_s29, %s720_s5  }
  0x45   : > { %161 = sbr.rel (%p852_p12) target bundleno = 169 (0xa9), region = 28  ;;  %s896_s16 = sand.u32 (!%p852_p12), 1, %s708_s10  }
  0x46   : > { %s899_s30 = sshll.u32 (!%p852_p12), %s896_s16, 3  ;;  %s164_s4 = scalar_lea.sflag (!%p852_p12), [#allocation3], %s896_s16 }
  0x47   : > { %s167_s3 = scalar_lea.vmem (!%p852_p12), [#allocation2], %s899_s30  ;;  %p1062_p6 = scmp.ne.s32.totalorder (!%p852_p12), %s1057_s20, 0 }
  0x4a   : > { %691 = dma.done.wait (%p1062_p6), %s164_s4, 128  }
  0x4b   : > { %693 = vsyncadd (%p1062_p6), %s164_s4, 4294967168  ;;  %s173_s29 = scalar_lea.sflag [#allocation6], %s896_s16  ;;  %s176_s5 = scalar_lea.vmem [#allocation5], %s899_s30 }
  0x4c   : > { %695 = dma.done.wait (%p1062_p6), %s173_s29, 128  }
  0x4d   : > { %697 = vsyncadd (%p1062_p6), %s173_s29, 4294967168  ;;  %vm213_vm0 = vcmask 254976   ;;  %v913_v0 = vld [vmem:[%s167_s3] sm:$0x3]  ;;  %v915_v1 = vld [vmem:[%s176_s5] sm:$0x3] }
  0x4e   : > { %v917_v2 = vld [vmem:[%s167_s3 + $0x2] sm:$0x3]  ;;  %v214_v3 = vsel %vm213_vm0, %v913_v0, 0.0  ;;  %v246_v4 = vsel %vm213_vm0, %v915_v1, 0.0  ;;  %v923_v5 = vld [vmem:[%s176_s5 + $0x2] sm:$0x3] }
  0x4f   : > { %v221_v6 = vsel %vm213_vm0, %v917_v2, 0.0  ;;  %v215_v7 = vrot.slane %v214_v3, 4  ;;  %v247_v8 = vrot.slane %v246_v4, 4  ;;  %v253_v10 = vsel %vm213_vm0, %v923_v5, 0.0  ;;  %v929_v11 = vld [vmem:[%s167_s3 + $0x4] sm:$0x3] }
  0x50   : > { %v222_v9 = vrot.slane %v221_v6, 4  ;;  %v254_v12 = vrot.slane %v253_v10, 4  ;;  %v931_v13 = vld [vmem:[%s176_s5 + $0x4] sm:$0x3]  ;;  %v228_v14 = vsel %vm213_vm0, %v929_v11, 0.0  ;;  %s201_s20 = scalar_lea.vmem [#allocation7], %s899_s30 }
  0x51   : > { %v935_v15 = vld [vmem:[%s167_s3 + $0x6] sm:$0x3]  ;;  %v216_v16 = vadd.f32 %v215_v7, %v214_v3  ;;  %v248_v17 = vadd.f32 %v247_v8, %v246_v4  ;;  %v229_v19 = vrot.slane %v228_v14, 4  ;;  %v937_v20 = vld [vmem:[%s176_s5 + $0x6] sm:$0x3]  ;;  %v260_v22 = vsel %vm213_vm0, %v931_v13, 0.0 }
  0x52   : > { %v223_v18 = vadd.f32 %v222_v9, %v221_v6  ;;  %v255_v21 = vadd.f32 %v254_v12, %v253_v10  ;;  %v235_v23 = vsel %vm213_vm0, %v935_v15, 0.0  ;;  %v267_v24 = vsel %vm213_vm0, %v937_v20, 0.0  ;;  %s404_s6 = sshll.u32 %s201_s20, 4  ;;  %s520_s14 = sshll.u32 %s761_s13, 7  ;;  %s1000_s6 = int_to_ptr.vmem [resolvable:$true] %s404_s6 }
  0x53   : > { %v217_v25 = vrot.slane %v216_v16, 2  ;;  %v249_v26 = vrot.slane %v248_v17, 2  ;;  %v230_v28 = vadd.f32 %v229_v19, %v228_v14  ;;  %v261_v30 = vrot.slane %v260_v22, 4  ;;  %s1005_s19 = scalar_lea.hbm %s1053_s2, %s520_s14  ;;  %s391_s13 = scalar_lea.sflag [#allocation4], %s896_s16 }
  0x54   : > { %v224_v27 = vrot.slane %v223_v18, 2  ;;  %v256_v29 = vrot.slane %v255_v21, 2  ;;  %v236_v31 = vrot.slane %v235_v23, 4  ;;  %v268_v32 = vrot.slane %v267_v24, 4  ;;  %s648_s24 = scalar_lea.vmem %s1000_s6, 128  ;;  %p1063_p1 = scmp.ne.s32.totalorder %s1058_s21, 0 }
  0x55   : > { %v218_v33 = vadd.f32 %v217_v25, %v216_v16  ;;  %v250_v34 = vadd.f32 %v249_v26, %v248_v17  ;;  %v231_v36 = vrot.slane %v230_v28, 2  ;;  %v262_v38 = vadd.f32 %v261_v30, %v260_v22  ;;  %p649_p13 = scmp.ne.s32.totalorder %s1000_s6, %s648_s24  ;;  %s722_s26 = smov [#allocation7]  }
  0x56   : > { %v225_v35 = vadd.f32 %v224_v27, %v223_v18  ;;  %v257_v37 = vadd.f32 %v256_v29, %v255_v21  ;;  %v237_v39 = vadd.f32 %v236_v31, %v235_v23  ;;  %v269_v40 = vadd.f32 %v268_v32, %v267_v24  ;;  %s652_s27 = sshll.u32 %s722_s26, 4  ;;  %s653_s27 = int_to_ptr.vmem [resolvable:$false] %s652_s27 }
  0x57   : > { %v219_v41 = vrot.slane %v218_v33, 1  ;;  %v251_v42 = vrot.slane %v250_v34, 1  ;;  %v232_v44 = vadd.f32 %v231_v36, %v230_v28  ;;  %v263_v46 = vrot.slane %v262_v38, 2  ;;  %p650_p12 = pnand %p649_p13, %p1063_p1  ;;  %s654_s23 = scalar_lea.vmem %s653_s27, 256 }
  0x58   : > { %v226_v43 = vrot.slane %v225_v35, 1  ;;  %v258_v45 = vrot.slane %v257_v37, 1  ;;  %v238_v47 = vrot.slane %v237_v39, 2  ;;  %v270_v48 = vrot.slane %v269_v40, 2  ;;  %p655_p10 = scmp.lt.s32.totalorder %s1000_s6, %s653_s27  ;;  %p656_p0 = scmp.lt.s32.totalorder %s654_s23, %s648_s24 }
  0x59   : > { %v220_v49 = vadd.f32 %v219_v41, %v218_v33  ;;  %v252_v50 = vadd.f32 %v251_v42, %v250_v34  ;;  %v233_v52 = vrot.slane %v232_v44, 1  ;;  %v264_v54 = vadd.f32 %v263_v46, %v262_v38  ;;  %p651_p7 = pneg %p650_p12 }
  0x5a   : > { %v227_v51 = vadd.f32 %v226_v43, %v225_v35  ;;  %v259_v53 = vadd.f32 %v258_v45, %v257_v37  ;;  %v239_v55 = vadd.f32 %v238_v47, %v237_v39  ;;  %v271_v56 = vadd.f32 %v270_v48, %v269_v40  ;;  %p657_p2 = por %p656_p0, %p655_p10 }
  0x5b   : > { %v242_v57 = vmul.f32 0.5, %v220_v49  ;;  %v945_v58 = vmul.f32 0.5, %v252_v50  ;;  %v234_v60 = vadd.f32 %v233_v52, %v232_v44  ;;  %v265_v62 = vrot.slane %v264_v54, 1 }
  0x5c   : > { %v243_v59 = vmul.f32 0.5, %v227_v51  ;;  %v947_v61 = vmul.f32 0.5, %v259_v53  ;;  %v240_v63 = vrot.slane %v239_v55, 1  ;;  %v272_v3 = vrot.slane %v271_v56, 1  ;;  %p658_p4 = pnand %p657_p2, %p651_p7 }
  0x5d   : > { %v950_v4 = vsub.f32 %v913_v0, %v242_v57  ;;  %v282_v6 = vsub.f32 %v915_v1, %v945_v58  ;;  %v244_v8 = vmul.f32 0.5, %v234_v60  ;;  %v266_v10 = vadd.f32 %v265_v62, %v264_v54 }
  0x5e   : > { %v955_v7 = vsub.f32 %v917_v2, %v243_v59  ;;  %v283_v9 = vsub.f32 %v923_v5, %v947_v61  ;;  %v241_v12 = vadd.f32 %v240_v63, %v239_v55  ;;  %v273_v14 = vadd.f32 %v272_v3, %v271_v56 }
  0x5f   : > { %v286_v16 = vmul.f32 %v950_v4, %v950_v4  ;;  %v318_v17 = vmul.f32 %v282_v6, %v282_v6  ;;  %v964_v18 = vsub.f32 %v929_v11, %v244_v8  ;;  %v966_v2 = vmul.f32 0.5, %v266_v10 }
  0x60   : > { %v287_v0 = vmul.f32 %v955_v7, %v955_v7  ;;  %v319_v1 = vmul.f32 %v283_v9, %v283_v9  ;;  %v245_v19 = vmul.f32 0.5, %v241_v12  ;;  %v968_v21 = vmul.f32 0.5, %v273_v14 }
  0x61   : > { %v290_v5 = vsel %vm213_vm0, %v286_v16, 0.0  ;;  %v322_v22 = vsel %vm213_vm0, %v318_v17, 0.0  ;;  %v288_v24 = vmul.f32 %v964_v18, %v964_v18  ;;  %v284_v29 = vsub.f32 %v931_v13, %v966_v2 }
  0x62   : > { %v297_v23 = vsel %vm213_vm0, %v287_v0, 0.0  ;;  %v291_v25 = vrot.slane %v290_v5, 4  ;;  %v323_v26 = vrot.slane %v322_v22, 4  ;;  %v329_v11 = vsel %vm213_vm0, %v319_v1, 0.0 }
  0x63   : > { %v298_v27 = vrot.slane %v297_v23, 4  ;;  %v330_v28 = vrot.slane %v329_v11, 4  ;;  %v304_v30 = vsel %vm213_vm0, %v288_v24, 0.0  ;;  %v980_v31 = vsub.f32 %v935_v15, %v245_v19 }
  0x64   : > { %v292_v32 = vadd.f32 %v291_v25, %v290_v5  ;;  %v324_v33 = vadd.f32 %v323_v26, %v322_v22  ;;  %v320_v36 = vmul.f32 %v284_v29, %v284_v29  ;;  %v285_v37 = vsub.f32 %v937_v20, %v968_v21 }
  0x65   : > { %v299_v34 = vadd.f32 %v298_v27, %v297_v23  ;;  %v331_v35 = vadd.f32 %v330_v28, %v329_v11  ;;  %v289_v38 = vmul.f32 %v980_v31, %v980_v31  ;;  %v305_v40 = vrot.slane %v304_v30, 4 }
  0x66   : > { %v325_v39 = vrot.slane %v324_v33, 2  ;;  %v336_v13 = vsel %vm213_vm0, %v320_v36, 0.0  ;;  %v321_v15 = vmul.f32 %v285_v37, %v285_v37  ;;  %v293_v43 = vrot.slane %v292_v32, 2 }
  0x67   : > { %v332_v41 = vrot.slane %v331_v35, 2  ;;  %v311_v42 = vsel %vm213_vm0, %v289_v38, 0.0  ;;  %v300_v45 = vrot.slane %v299_v34, 2  ;;  %v337_v47 = vrot.slane %v336_v13, 4 }
  0x68   : > { %v326_v44 = vadd.f32 %v325_v39, %v324_v33  ;;  %v312_v48 = vrot.slane %v311_v42, 4  ;;  %v343_v49 = vsel %vm213_vm0, %v321_v15, 0.0  ;;  %v306_v51 = vadd.f32 %v305_v40, %v304_v30 }
  0x69   : > { %v333_v46 = vadd.f32 %v332_v41, %v331_v35  ;;  %v338_v52 = vadd.f32 %v337_v47, %v336_v13  ;;  %v344_v53 = vrot.slane %v343_v49, 4  ;;  %v294_v54 = vadd.f32 %v293_v43, %v292_v32 }
  0x6a   : > { %v327_v20 = vrot.slane %v326_v44, 1  ;;  %v301_v56 = vadd.f32 %v300_v45, %v299_v34  ;;  %v313_v60 = vadd.f32 %v312_v48, %v311_v42  ;;  %v307_v6 = vrot.slane %v306_v51, 2 }
  0x6b   : > { %v334_v50 = vrot.slane %v333_v46, 1  ;;  %v339_v59 = vrot.slane %v338_v52, 2  ;;  %v345_v62 = vadd.f32 %v344_v53, %v343_v49  ;;  %v295_v10 = vrot.slane %v294_v54, 1 }
  0x6c   : > { %v328_v55 = vadd.f32 %v327_v20, %v326_v44  ;;  %v302_v14 = vrot.slane %v301_v56, 1  ;;  %v314_v0 = vrot.slane %v313_v60, 2  ;;  %v308_v19 = vadd.f32 %v307_v6, %v306_v51 }
  0x6d   : > { %v335_v57 = vadd.f32 %v334_v50, %v333_v46  ;;  %v340_v8 = vadd.f32 %v339_v59, %v338_v52  ;;  %v346_v9 = vrot.slane %v345_v62, 2  ;;  %v296_v23 = vadd.f32 %v295_v10, %v294_v54 }
  0x6e   : > { %v358_v63 = vadd.f32 2.3e-08, %v328_v55  ;;  %v303_v24 = vadd.f32 %v302_v14, %v301_v56  ;;  %v315_v26 = vadd.f32 %v314_v0, %v313_v60  ;;  %v309_v11 = vrot.slane %v308_v19, 1 }
  0x6f   : > { %v359_v3 = vadd.f32 2.3e-08, %v335_v57  ;;  %v341_v17 = vrot.slane %v340_v8, 1  ;;  %v347_v1 = vadd.f32 %v346_v9, %v345_v62  ;;  %v350_v30 = vadd.f32 2.3e-08, %v296_v23 }
  0x70   : > { %v362_v12 = vmul.f32 2.0, %v358_v63  ;;  %v351_v32 = vadd.f32 2.3e-08, %v303_v24  ;;  %v316_v33 = vrot.slane %v315_v26, 1  ;;  %v310_v35 = vadd.f32 %v309_v11, %v308_v19 }
  0x71   : > { %v363_v16 = vmul.f32 2.0, %v359_v3  ;;  %v342_v5 = vadd.f32 %v341_v17, %v340_v8  ;;  %v348_v22 = vrot.slane %v347_v1, 1  ;;  %v354_v36 = vmul.f32 2.0, %v350_v30 }
  0x72   : > { %576 = vrcp.f32 %v362_v12  ;;  %v355_v37 = vmul.f32 2.0, %v351_v32  ;;  %v317_v38 = vadd.f32 %v316_v33, %v315_v26  ;;  %v352_v40 = vadd.f32 2.3e-08, %v310_v35 }
  0x73   : > { %578 = vrcp.f32 %v363_v16  ;;  %v360_v25 = vadd.f32 2.3e-08, %v342_v5  ;;  %v349_v27 = vadd.f32 %v348_v22, %v347_v1 }
  0x74   : > { %v353_v15 = vadd.f32 2.3e-08, %v317_v38  ;;  %v356_v43 = vmul.f32 2.0, %v352_v40 }
  0x75   : > { %v364_v28 = vmul.f32 2.0, %v360_v25  ;;  %v361_v29 = vadd.f32 2.3e-08, %v349_v27 }
  0x76   : > { %v357_v44 = vmul.f32 2.0, %v353_v15 }
  0x77   : > { %580 = vrcp.f32 %v364_v28  ;;  %v365_v34 = vmul.f32 2.0, %v361_v29 }
  0x79   : > { %582 = vrcp.f32 %v365_v34 }
  0x7f   : > { %v577_v39 = vpop.eup %576 }
  0x80   : > { %v579_v41 = vpop.eup %578  ;;  %v367_v13 = vmul.f32 %v577_v39, %v354_v36 }
  0x81   : > { %v369_v42 = vmul.f32 %v579_v41, %v355_v37 }
  0x82   : > { %584 = vrsqrt.f32 %v367_v13 }
  0x83   : > { %586 = vrsqrt.f32 %v369_v42 }
  0x84   : > { %v581_v45 = vpop.eup %580 }
  0x85   : > { %v371_v46 = vmul.f32 %v581_v45, %v356_v43 }
  0x86   : > { %v583_v47 = vpop.eup %582 }
  0x87   : > { %588 = vrsqrt.f32 %v371_v46  ;;  %v373_v48 = vmul.f32 %v583_v47, %v357_v44 }
  0x89   : > { %590 = vrsqrt.f32 %v373_v48 }
  0x8f   : > { %v585_v49 = vpop.eup %584 }
  0x90   : > { %v587_v20 = vpop.eup %586  ;;  %v378_v50 = vmul.f32 %v585_v49, %v950_v4 }
  0x91   : > { %v379_v51 = vmul.f32 %v587_v20, %v955_v7 }
  0x92   : > { %v382_v52 = vadd.f32 %v378_v50, %v945_v58 }
  0x93   : > { %v383_v53 = vadd.f32 %v379_v51, %v947_v61 }
  0x94   : > { %386 = vst.msk [vmem:[%s201_s20] sm:$0x3] %vm213_vm0, %v382_v52  ;;  %v589_v54 = vpop.eup %588 }
  0x95   : > { %387 = vst.msk [vmem:[%s201_s20 + $0x2] sm:$0x3] %vm213_vm0, %v383_v53  ;;  %v380_v55 = vmul.f32 %v589_v54, %v964_v18 }
  0x96   : > { %v591_v56 = vpop.eup %590 }
  0x97   : > { %v384_v4 = vadd.f32 %v380_v55, %v966_v2  ;;  %v381_v7 = vmul.f32 %v591_v56, %v980_v31 }
  0x99   : > { %388 = vst.msk [vmem:[%s201_s20 + $0x4] sm:$0x3] %vm213_vm0, %v384_v4  ;;  %v385_v58 = vadd.f32 %v381_v7, %v968_v21 }
  0x9b   : > { %389 = vst.msk [vmem:[%s201_s20 + $0x6] sm:$0x3] %vm213_vm0, %v385_v58 }
  0x9c   : > { %661 = shalt.err (!%p658_p4)
}
  0x9d   : > { %s662_s25 = scalar_lea.hbm %s1005_s19, 128  ;;  %s666_s30 = scalar_lea.hbm %s1053_s2, 256 }
  0x9e   : > { %p663_p9 = scmp.ne.s32.totalorder %s1005_s19, %s662_s25  ;;  %p667_p5 = scmp.lt.s32.totalorder %s1005_s19, %s1053_s2 }
  0x9f   : > { %p668_p8 = scmp.lt.s32.totalorder %s666_s30, %s662_s25 }
  0xa0   : > { %p664_p11 = pnand %p663_p9, %p1063_p1 }
  0xa1   : > { %p669_p6 = por %p668_p8, %p667_p5 }
  0xa2   : > { %p665_p3 = pneg %p664_p11 }
  0xa4   : > { %p670_p13 = pnand %p669_p6, %p665_p3 }
  0xa6   : > { %673 = shalt.err (!%p670_p13)
}
  0xa7   : > { %s723_s29 = smov 32   ;;  %s724_s5 = smov 2  }
  0xa8   : > { %525 = dma.vmem_to_hbm [thread:$0]  (%p1063_p1), %s1000_s6, 128, %s1005_s19, %s391_s13, %s723_s29, %s723_s29, %s724_s5  }
  0xa9 PF: > { %s419_s20 = sand.u32 1, %s704_s9   ;;  %p1064_p12 = scmp.ne.s32.totalorder %s1059_s22, 0 }
  0xaa   : > { %p1065_p7 = scmp.ge.s32.totalorder %s716_s12, 2  ;;  %s420_s14 = scalar_lea.sflag [#allocation4], %s419_s20 }
  0xac   : > { %p535_p10 = pnand %p1065_p7, %p1064_p12 }
  0xae   : > { %p536_p0 = pneg %p535_p10 }
  0xb0   : > { %699 = dma.done.wait (%p536_p0), %s420_s14, 128  }
  0xb1   : > { %701 = vsyncadd (%p536_p0), %s420_s14, 4294967168  ;;  %p18_p2 = scmp.ge.s32.totalorder %s765_s15, 4   ;;  %s1066_s9 = smov %s708_s10 }
  0xb2   : > { %s1067_s10 = smov %s712_s11  ;;  %s1068_s11 = smov %s777_s18 }
  0xb3   : > { %s1069_s12 = smov %s765_s15  ;;  %20 = sbr.rel (!%p18_p2) target bundleno = 7 (0x7), region = 86 }
  0xb8   :  { %425 = vsyncpa [#allocation3], 1 }
  0xb9   :  { %427 = vsyncpa [#allocation3 + $0x1], 1 }
  0xba   :  { %428 = vsyncpa [#allocation6], 1 }
  0xbb   :  { %430 = vsyncpa [#allocation6 + $0x1], 1 }
  0xbc   :  { %431 = vsyncpa [#allocation4], 1 }
  0xbd   :  { %433 = vsyncpa [#allocation4 + $0x1], 1 }

</bundles_post_ra>
